<compile_context>
chip_gen: v6e
topology: v6e:2x2x1
jax: 0.10.0
libtpu: 0.0.40
codegen_flags: <defaults>
</compile_context>

<pallas_src>
import jax
import jax.numpy as jnp
from jax.experimental import pallas as pl
from jax.experimental.pallas import tpu as pltpu

IN_FEATURES = 28 * 28   # 784
OUT_FEATURES = 10
LANE = 128


def _round_up(x, m):
    return ((x + m - 1) // m) * m


def _mlp_kernel(x_ref, w1_ref, b1_ref, w2_ref, b2_ref, o_ref):
    # First layer: (TB, 784) bf16 @ (784, H_pad) bf16 -> f32 accumulate on the MXU.
    h = jnp.dot(x_ref[...], w1_ref[...], preferred_element_type=jnp.float32)
    # Bias add (VPU) + sigmoid (EUP) in f32.  Mean-field scaling is folded into W2.
    h = jax.nn.sigmoid(h + b1_ref[...])
    # Second layer: (TB, H_pad) @ (H_pad, 128) -> lane-dense f32 output tile.
    out = jnp.dot(h.astype(w2_ref.dtype), w2_ref[...],
                  preferred_element_type=jnp.float32)
    o_ref[...] = (out + b2_ref[...]).astype(o_ref.dtype)


def mlp_forward(x, w1_t, b1, w2_t, b2, *, hidden_units, gamma, batch_tile=256):
    """x: (B, 1, 28, 28) or (B, 784).  w1_t: (784, H), b1: (1, H) or (H,),
    w2_t: (H, 10), b2: (1, 10) or (10,).  Returns (B, 10) float32."""
    B = x.shape[0]
    H = hidden_units
    x2d = x.reshape(B, IN_FEATURES).astype(jnp.float32)
    scaling = float(H) ** (-float(gamma))

    # --- lane-dense padding (exactness preserved) ---
    H_pad = _round_up(max(H, LANE), LANE)   # hidden 32 -> 128
    N_pad = LANE                            # output 10 -> 128

    w1_p = jnp.zeros((IN_FEATURES, H_pad), jnp.float32).at[:, :H].set(
        w1_t.astype(jnp.float32))
    b1_p = jnp.zeros((1, H_pad), jnp.float32).at[:, :H].set(
        b1.reshape(1, H).astype(jnp.float32))
    # Fold the mean-field scaling into W2.  IMPORTANT: the padded hidden rows of W2
    # are exactly zero, so padded hidden channels (sigmoid(0)=0.5, not zero) contribute
    # nothing to the output.
    w2_p = jnp.zeros((H_pad, N_pad), jnp.float32).at[:H, :OUT_FEATURES].set(
        scaling * w2_t.astype(jnp.float32))
    b2_p = jnp.zeros((1, N_pad), jnp.float32).at[:, :OUT_FEATURES].set(
        b2.reshape(1, OUT_FEATURES).astype(jnp.float32))

    # bf16 MXU operands (f32 accumulate inside the kernel); biases stay f32.
    w1_b = w1_p.astype(jnp.bfloat16)
    w2_b = w2_p.astype(jnp.bfloat16)

    # Batch tiling: small batches use a single tile; large batches use 256-row tiles.
    TB = min(batch_tile, _round_up(B, 8))
    B_pad = _round_up(B, TB)
    x_b = jnp.zeros((B_pad, IN_FEATURES), jnp.bfloat16).at[:B].set(
        x2d.astype(jnp.bfloat16))

    grid = (B_pad // TB,)

    out = pl.pallas_call(
        _mlp_kernel,
        out_shape=jax.ShapeDtypeStruct((B_pad, N_pad), jnp.float32),
        grid=grid,
        in_specs=[
            pl.BlockSpec((TB, IN_FEATURES), lambda i: (i, 0)),     # x tile, pipelined
            pl.BlockSpec((IN_FEATURES, H_pad), lambda i: (0, 0)),  # W1 stays VMEM-resident
            pl.BlockSpec((1, H_pad), lambda i: (0, 0)),            # b1
            pl.BlockSpec((H_pad, N_pad), lambda i: (0, 0)),        # W2 (scaled) resident
            pl.BlockSpec((1, N_pad), lambda i: (0, 0)),            # b2
        ],
        out_specs=pl.BlockSpec((TB, N_pad), lambda i: (i, 0)),
        compiler_params=pltpu.CompilerParams(
            dimension_semantics=("parallel",)),
    )(x_b, w1_b, b1_p, w2_b, b2_p)

    return out[:B, :OUT_FEATURES]


def init_params(key, hidden_units):
    """Deterministic params matching the PyTorch module's init scheme."""
    k1, k2, k3, k4 = jax.random.split(key, 4)
    in_f = IN_FEATURES
    # fc1.weight ~ Normal(0, 1), shape (hidden, 784) in torch -> store transposed (784, hidden)
    w1 = jax.random.normal(k1, (hidden_units, in_f), dtype=jnp.float32)
    # fc1.bias: torch default Linear init U(-1/sqrt(in), 1/sqrt(in))
    bound1 = 1.0 / (in_f ** 0.5)
    b1 = jax.random.uniform(k2, (1, hidden_units), minval=-bound1, maxval=bound1,
                            dtype=jnp.float32)
    # fc2.weight ~ Uniform(0, 1), shape (10, hidden) -> store transposed (hidden, 10)
    w2 = jax.random.uniform(k3, (10, hidden_units), minval=0.0, maxval=1.0,
                            dtype=jnp.float32)
    bound2 = 1.0 / (hidden_units ** 0.5)
    b2 = jax.random.uniform(k4, (1, 10), minval=-bound2, maxval=bound2,
                            dtype=jnp.float32)
    return w1.T, b1, w2.T, b2


if __name__ == "__main__":
    hidden_units = 32
    gamma = 0.5
    batch = 8

    key = jax.random.PRNGKey(0)
    kx, kp = jax.random.split(key)
    x = jax.random.normal(kx, (batch, 1, 28, 28), dtype=jnp.float32)
    w1_t, b1, w2_t, b2 = init_params(kp, hidden_units)

    out = mlp_forward(x, w1_t, b1, w2_t, b2,
                      hidden_units=hidden_units, gamma=gamma)
    out = jax.block_until_ready(out)
    assert out.shape == (batch, 10)

    # Reference in plain JAX using the same bf16-input / f32-accumulate math as the kernel.
    scaling = hidden_units ** (-gamma)
    xb = x.reshape(batch, -1).astype(jnp.bfloat16)
    w1b = w1_t.astype(jnp.bfloat16)
    w2b = (scaling * w2_t).astype(jnp.bfloat16)
    h_ref = jax.nn.sigmoid(
        jnp.dot(xb, w1b, preferred_element_type=jnp.float32) + b1)
    ref = jnp.dot(h_ref.astype(jnp.bfloat16), w2b,
                  preferred_element_type=jnp.float32) + b2
    assert jnp.allclose(out, ref, atol=2e-3, rtol=2e-3), (
        float(jnp.max(jnp.abs(out - ref))))

    # Loose sanity check against the full-f32 reference (bf16 rounding only).
    h_f32 = scaling * jax.nn.sigmoid(x.reshape(batch, -1) @ w1_t + b1)
    ref_f32 = h_f32 @ w2_t + b2
    assert jnp.allclose(out, ref_f32, atol=1e-1, rtol=1e-1)

    print("KERNEL_OK")
</pallas_src>

<mosaic_0001>
module attributes {stable_mosaic.version = 11 : i64} {
  func.func @_mlp_kernel(%arg0: i32, %arg1: memref<8x784xbf16, #tpu.memory_space<vmem>>, %arg2: memref<784x128xbf16, #tpu.memory_space<vmem>>, %arg3: memref<1x128xf32, #tpu.memory_space<vmem>>, %arg4: memref<128x128xbf16, #tpu.memory_space<vmem>>, %arg5: memref<1x128xf32, #tpu.memory_space<vmem>>, %arg6: memref<8x128xf32, #tpu.memory_space<vmem>>) attributes {dimension_semantics = [#tpu.dimension_semantics<parallel>], iteration_bounds = array<i64: 1>, scalar_prefetch = 0 : i64, scratch_operands = 0 : i64, tpu.core_type = #tpu.core_type<tc>, window_params = [{transform_indices = @transform_0, window_bounds = array<i64: 8, 784>}, {pipeline_mode = #tpu.pipeline_mode<synchronous>, transform_indices = @transform_1, window_bounds = array<i64: 784, 128>}, {pipeline_mode = #tpu.pipeline_mode<synchronous>, transform_indices = @transform_2, window_bounds = array<i64: 1, 128>}, {pipeline_mode = #tpu.pipeline_mode<synchronous>, transform_indices = @transform_3, window_bounds = array<i64: 128, 128>}, {pipeline_mode = #tpu.pipeline_mode<synchronous>, transform_indices = @transform_4, window_bounds = array<i64: 1, 128>}, {transform_indices = @transform_5, window_bounds = array<i64: 8, 128>}]} {
    %c0 = arith.constant 0 : index
    %c0_0 = arith.constant 0 : index
    %0 = vector.load %arg1[%c0, %c0_0] : memref<8x784xbf16, #tpu.memory_space<vmem>>, vector<8x784xbf16>
    %c0_1 = arith.constant 0 : index
    %c0_2 = arith.constant 0 : index
    %1 = vector.load %arg2[%c0_1, %c0_2] : memref<784x128xbf16, #tpu.memory_space<vmem>>, vector<784x128xbf16>
    %cst = arith.constant dense<0.000000e+00> : vector<8x128xf32>
    %2 = tpu.matmul %0, %1, %cst {dimension_numbers = #tpu.dot_dimension_numbers<[1], [0], [0], [1], [0, 0, 1, 1], [], []>} : vector<8x784xbf16>, vector<784x128xbf16>, vector<8x128xf32> -> vector<8x128xf32>
    %c0_3 = arith.constant 0 : index
    %c0_4 = arith.constant 0 : index
    %3 = vector.load %arg3[%c0_3, %c0_4] : memref<1x128xf32, #tpu.memory_space<vmem>>, vector<1x128xf32>
    %4 = vector.broadcast %3 : vector<1x128xf32> to vector<8x128xf32>
    %5 = arith.addf %2, %4 : vector<8x128xf32>
    %6 = arith.negf %5 : vector<8x128xf32>
    %7 = math.exp %6 : vector<8x128xf32>
    %cst_5 = arith.constant 1.000000e+00 : f32
    %8 = vector.broadcast %cst_5 : f32 to vector<8x128xf32>
    %9 = arith.addf %8, %7 : vector<8x128xf32>
    %10 = arith.divf %8, %9 : vector<8x128xf32>
    %11 = arith.truncf %10 : vector<8x128xf32> to vector<8x128xbf16>
    %c0_6 = arith.constant 0 : index
    %c0_7 = arith.constant 0 : index
    %12 = vector.load %arg4[%c0_6, %c0_7] : memref<128x128xbf16, #tpu.memory_space<vmem>>, vector<128x128xbf16>
    %cst_8 = arith.constant dense<0.000000e+00> : vector<8x128xf32>
    %13 = tpu.matmul %11, %12, %cst_8 {dimension_numbers = #tpu.dot_dimension_numbers<[1], [0], [0], [1], [0, 0, 1, 1], [], []>} : vector<8x128xbf16>, vector<128x128xbf16>, vector<8x128xf32> -> vector<8x128xf32>
    %c0_9 = arith.constant 0 : index
    %c0_10 = arith.constant 0 : index
    %14 = vector.load %arg5[%c0_9, %c0_10] : memref<1x128xf32, #tpu.memory_space<vmem>>, vector<1x128xf32>
    %15 = vector.broadcast %14 : vector<1x128xf32> to vector<8x128xf32>
    %16 = arith.addf %13, %15 : vector<8x128xf32>
    %c0_11 = arith.constant 0 : index
    %c0_12 = arith.constant 0 : index
    %17 = vector.load %arg6[%c0_11, %c0_12] : memref<8x128xf32, #tpu.memory_space<vmem>>, vector<8x128xf32>
    tpu.vector_store %arg6[%c0_11, %c0_12], %16 {strides = array<i32>} : memref<8x128xf32, #tpu.memory_space<vmem>>, vector<8x128xf32>,
    return
  }
  func.func @transform_0(%arg0: i32) -> (i32, i32) {
    %c0_i32 = arith.constant 0 : i32
    %c0_i32_0 = arith.constant 0 : i32
    return %arg0, %c0_i32 : i32, i32
  }
  func.func @transform_1(%arg0: i32) -> (i32, i32) {
    %c0_i32 = arith.constant 0 : i32
    %c0_i32_0 = arith.constant 0 : i32
    %c0_i32_1 = arith.constant 0 : i32
    return %c0_i32, %c0_i32_0 : i32, i32
  }
  func.func @transform_2(%arg0: i32) -> (i32, i32) {
    %c0_i32 = arith.constant 0 : i32
    %c0_i32_0 = arith.constant 0 : i32
    %c0_i32_1 = arith.constant 0 : i32
    return %c0_i32, %c0_i32_0 : i32, i32
  }
  func.func @transform_3(%arg0: i32) -> (i32, i32) {
    %c0_i32 = arith.constant 0 : i32
    %c0_i32_0 = arith.constant 0 : i32
    %c0_i32_1 = arith.constant 0 : i32
    return %c0_i32, %c0_i32_0 : i32, i32
  }
  func.func @transform_4(%arg0: i32) -> (i32, i32) {
    %c0_i32 = arith.constant 0 : i32
    %c0_i32_0 = arith.constant 0 : i32
    %c0_i32_1 = arith.constant 0 : i32
    return %c0_i32, %c0_i32_0 : i32, i32
  }
  func.func @transform_5(%arg0: i32) -> (i32, i32) {
    %c0_i32 = arith.constant 0 : i32
    %c0_i32_0 = arith.constant 0 : i32
    return %arg0, %c0_i32 : i32, i32
  }
}

</mosaic_0001>

<bundles_post_ra>
// kernel: tpu_custom_call.1
= control target key start
LH: loop header
LB: loop body
LE: loop exit
PB: predicated region body
PF: predicated region fallthrough
CT: control target
= control target key end

     0   :  { %10 = vsyncpa [#allocation3], 0  ;;  %s1178_s0 = inlined_call_operand.hbm [shape: bf16[8,784], index: 0, kind: input, shape index: {}]   ;;  %s1179_s1 = inlined_call_operand.hbm [shape: bf16[784,128], index: 1, kind: input, shape index: {}]   ;;  %s1180_s2 = inlined_call_operand.vmem [shape: f32[1,128], index: 2, kind: input, shape index: {}]   ;;  %s1181_s3 = inlined_call_operand.hbm [shape: bf16[128,128], index: 3, kind: input, shape index: {}]   ;;  %s1182_s4 = inlined_call_operand.vmem [shape: f32[1,128], index: 4, kind: input, shape index: {}]   ;;  %s1183_s5 = inlined_call_operand.hbm [shape: f32[8,128], index: 5, kind: output, shape index: {}]  }
   0x1   :  { %11 = vsyncpa [#allocation6], 0 }
   0x2   :  { %12 = vsyncpa [#allocation4], 0  ;;  %s1120_s18 = smov [#allocation5]  }
   0x3   :  { %s28_s19 = sshll.u32 %s1120_s18, 4  ;;  %s29_s19 = int_to_ptr.vmem [resolvable:$true] %s28_s19 }
   0x4   :  { %s1042_s20 = scalar_lea.vmem %s29_s19, 6272  ;;  %p1047_p1 = scmp.lt.s32.totalorder %s29_s19, %s29_s19 }
   0x5   :  { %p1043_p0 = scmp.ne.s32.totalorder %s29_s19, %s1042_s20  ;;  %p1048_p2 = scmp.lt.s32.totalorder %s1042_s20, %s1042_s20 }
   0x7   :  { %p1049_p3 = por %p1048_p2, %p1047_p1 }
   0x9   :  { %p1050_p4 = pnand %p1049_p3, %p1043_p0 }
   0xb   :  { %1053 = shalt.err (!%p1050_p4)
}
   0xc   :  { %s1121_s21 = smov 64   ;;  %s1122_s22 = smov 4  }
   0xd   :  { %34 = dma.hbm_to_vmem [thread:$0]  %s1179_s1, 6272, %s29_s19, [#allocation6], %s1121_s21, %s1121_s21, %s1122_s22  }
   0xe   :  { %s1123_s25 = smov [#allocation2]   ;;  %s1124_s27 = smov [#allocation7]  }
   0xf   :  { %s19_s26 = sshll.u32 %s1123_s25, 4  ;;  %s42_s28 = sshll.u32 %s1124_s27, 4  ;;  %s20_s26 = int_to_ptr.vmem [resolvable:$true] %s19_s26  ;;  %s43_s28 = int_to_ptr.vmem [resolvable:$true] %s42_s28 }
  0x10   :  { %s1062_s29 = scalar_lea.vmem %s20_s26, 448  ;;  %p1067_p6 = scmp.lt.s32.totalorder %s20_s26, %s20_s26 }
  0x11   :  { %p1063_p5 = scmp.ne.s32.totalorder %s20_s26, %s1062_s29  ;;  %p1068_p7 = scmp.lt.s32.totalorder %s1062_s29, %s1062_s29 }
  0x13   :  { %p1069_p8 = por %p1068_p7, %p1067_p6 }
  0x15   :  { %p1070_p9 = pnand %p1069_p8, %p1063_p5 }
  0x17   :  { %1073 = shalt.err (!%p1070_p9)
}
  0x18   :  { %22 = dma.hbm_to_vmem [thread:$0]  %s1178_s0, 448, %s20_s26, [#allocation3]  }
  0x19   :  { %s1082_s7 = scalar_lea.vmem %s43_s28, 1024  ;;  %p1087_p11 = scmp.lt.s32.totalorder %s43_s28, %s43_s28 }
  0x1a   :  { %p1083_p10 = scmp.ne.s32.totalorder %s43_s28, %s1082_s7  ;;  %p1088_p12 = scmp.lt.s32.totalorder %s1082_s7, %s1082_s7 }
  0x1c   :  { %p1089_p13 = por %p1088_p12, %p1087_p11 }
  0x1e   :  { %p1090_p0 = pnand %p1089_p13, %p1083_p10 }
  0x20   :  { %1093 = shalt.err (!%p1090_p0)
}
  0x21   :  { %48 = dma.hbm_to_vmem [thread:$0]  %s1181_s3, 1024, %s43_s28, [#allocation6], %s1121_s21, %s1121_s21, %s1122_s22  }
  0x22   :  { %1114 = dma.done.wait [#allocation3], 448  }
  0x23   :  { %1115 = vsyncadd [#allocation3], 4294966848 }
  0x24   :  { %1116 = dma.done.wait [#allocation6], 7296  }
  0x25   :  { %1117 = vsyncadd [#allocation6], 4294960000  ;;  %v966_v0 = vld [vmem:[#allocation5 + $0x78] sm:$0xff]   ;;  %v970_v4 = vld [vmem:[#allocation5 + $0x70] sm:$0xff]   ;;  %v1125_v43 = vmov 0.0   ;;  %vm1126_vm0 = vmmov 0  }
  0x26   :  { %v967_v1 = vld [vmem:[#allocation5 + $0x38] sm:$0xff]   ;;  %855 = vmatprep.subr.bf16.mxu0 %v966_v0  ;;  %v971_v5 = vld [vmem:[#allocation5 + $0x30] sm:$0xff]   ;;  %v974_v8 = vld [vmem:[#allocation5 + $0x68] sm:$0xff]   ;;  %vm488_vm1 = vcmask 130048   ;;  %s1127_s10 = smov [#allocation8]  }
  0x27   :  { %v968_v2 = vld [vmem:[#allocation5 + $0xf8] sm:$0xff]   ;;  %856 = vmatpush3.bf16.msra.mxu0 %v967_v1  ;;  %v972_v6 = vld [vmem:[#allocation5 + $0xf0] sm:$0xff]   ;;  %v975_v9 = vld [vmem:[#allocation5 + $0x28] sm:$0xff]   ;;  %s777_s11 = sshll.u32 %s1127_s10, 4  ;;  %s778_s11 = int_to_ptr.vmem [resolvable:$true] %s777_s11 }
  0x28   :  { %v969_v3 = vld [vmem:[#allocation5 + $0xb8] sm:$0xff]   ;;  %877 = vmatprep.subr.bf16.mxu1 %v968_v2  ;;  %857 = vmatprep.subr.bf16.mxu0 %v970_v4  ;;  %v973_v7 = vld [vmem:[#allocation5 + $0xb0] sm:$0xff]   ;;  %v976_v10 = vld [vmem:[#allocation5 + $0xe8] sm:$0xff]   ;;  %s1094_s12 = scalar_lea.vmem %s778_s11, 128  ;;  %p1099_p2 = scmp.lt.s32.totalorder %s778_s11, %s778_s11 }
  0x29   :  { %878 = vmatpush3.bf16.msra.mxu1 %v969_v3  ;;  %v977_v11 = vld [vmem:[#allocation5 + $0xa8] sm:$0xff]   ;;  %v978_v12 = vld [vmem:[#allocation5 + $0x60] sm:$0xff]   ;;  %v982_v16 = vld [vmem:[#allocation5 + $0x58] sm:$0xff]   ;;  %p1095_p1 = scmp.ne.s32.totalorder %s778_s11, %s1094_s12  ;;  %p1100_p3 = scmp.lt.s32.totalorder %s1094_s12, %s1094_s12 }
  0x2a   :  { %879 = vmatprep.subr.bf16.mxu1 %v972_v6  ;;  %v979_v13 = vld [vmem:[#allocation5 + $0x20] sm:$0xff]   ;;  %v983_v17 = vld [vmem:[#allocation5 + $0x18] sm:$0xff]   ;;  %v986_v20 = vld [vmem:[#allocation5 + $0x50] sm:$0xff]  }
  0x2b   :  { %858 = vmatpush3.bf16.msra.mxu0 %v971_v5  ;;  %v980_v14 = vld [vmem:[#allocation5 + $0xe0] sm:$0xff]   ;;  %v984_v18 = vld [vmem:[#allocation5 + $0xd8] sm:$0xff]   ;;  %v987_v21 = vld [vmem:[#allocation5 + $0x10] sm:$0xff]   ;;  %p1101_p4 = por %p1100_p3, %p1099_p2 }
  0x2c   :  { %859 = vmatprep.subr.bf16.mxu0 %v974_v8  ;;  %v981_v15 = vld [vmem:[#allocation5 + $0xa0] sm:$0xff]   ;;  %v985_v19 = vld [vmem:[#allocation5 + $0x98] sm:$0xff]   ;;  %v988_v22 = vld [vmem:[#allocation5 + $0xd0] sm:$0xff]  }
  0x2d   :  { %880 = vmatpush3.bf16.msra.mxu1 %v973_v7  ;;  %v989_v23 = vld [vmem:[#allocation5 + $0x90] sm:$0xff]   ;;  %v990_v24 = vld [vmem:[#allocation5 + $0x48] sm:$0xff]   ;;  %v994_v28 = vld [vmem:[#allocation5 + $0x40] sm:$0xff]   ;;  %p1102_p5 = pnand %p1101_p4, %p1095_p1 }
  0x2e   :  { %881 = vmatprep.subr.bf16.mxu1 %v976_v10  ;;  %v991_v25 = vld [vmem:[#allocation5 + $0x8] sm:$0xff]   ;;  %v995_v29 = vld [vmem:[#allocation5] sm:$0xff]   ;;  %v1000_v35 = vld [vmem:[#allocation5 + $0x178] sm:$0xff]  }
  0x2f   :  { %860 = vmatpush3.bf16.msra.mxu0 %v975_v9  ;;  %v992_v26 = vld [vmem:[#allocation5 + $0xc8] sm:$0xff]   ;;  %v996_v30 = vld [vmem:[#allocation5 + $0xc0] sm:$0xff]   ;;  %v1003_v39 = vld [vmem:[#allocation5 + $0x138] sm:$0xff]  }
  0x30   :  { %861 = vmatprep.subr.bf16.mxu0 %v978_v12  ;;  %v993_v27 = vld [vmem:[#allocation5 + $0x88] sm:$0xff]   ;;  %v999_v34 = vld [vmem:[#allocation5 + $0x80] sm:$0xff]   ;;  %v1004_v40 = vld [vmem:[#allocation5 + $0x170] sm:$0xff]  }
  0x31   :  { %882 = vmatpush3.bf16.msra.mxu1 %v977_v11  ;;  %v61_v31 = vld [vmem:[#allocation2] sm:$0xff]  ;;  %v62_v36 = vld [vmem:[#allocation2 + $0x8] sm:$0xff]  ;;  %v1010_v47 = vld [vmem:[#allocation5 + $0x158] sm:$0xff]  }
  0x32   :  { %883 = vmatprep.subr.bf16.mxu1 %v980_v14  ;;  %v788_v32 = vcombine.low %v61_v31, %v61_v31  ;;  %v789_v33 = vcombine.high %v61_v31, %v61_v31  ;;  %v790_v37 = vcombine.low %v62_v36, %v62_v36  ;;  %v791_v38 = vcombine.high %v62_v36, %v62_v36  ;;  %v1005_v41 = vld [vmem:[#allocation5 + $0x130] sm:$0xff]   ;;  %v1006_v42 = vld [vmem:[#allocation5 + $0x168] sm:$0xff]   ;;  %v1008_v45 = vld [vmem:[#allocation5 + $0x160] sm:$0xff]  }
  0x33   :  { %862 = vmatpush3.bf16.msra.mxu0 %v979_v13  ;;  %v1007_v44 = vld [vmem:[#allocation5 + $0x128] sm:$0xff]   ;;  %v1009_v46 = vld [vmem:[#allocation5 + $0x120] sm:$0xff]   ;;  %v1011_v48 = vld [vmem:[#allocation5 + $0x118] sm:$0xff]  }
  0x34   :  { %863 = vmatprep.subr.bf16.mxu0 %v982_v16  ;;  %524 = vmatprep.mubr.bf16.mxu0 %v789_v33  ;;  %v1012_v49 = vld [vmem:[#allocation5 + $0x150] sm:$0xff]   ;;  %v1018_v50 = vld [vmem:[#allocation5 + $0x180] sm:$0xff]   ;;  %v1021_v54 = vld [vmem:[#allocation2 + $0x18] ss:$0 sps:$4 sm:$0xff]  }
  0x35   :  { %884 = vmatpush3.bf16.msra.mxu1 %v981_v15  ;;  %564 = vmatprep.mubr.bf16.mxu1 %v791_v38  ;;  %v63_v51 = vld [vmem:[#allocation2 + $0x10] sm:$0xff]  ;;  %v1014_v55 = vld [vmem:[#allocation5 + $0x148] sm:$0xff]   ;;  %v1016_v57 = vld [vmem:[#allocation5 + $0x140] sm:$0xff]  }
  0x36   :  { %885 = vmatprep.subr.bf16.mxu1 %v984_v18  ;;  %v1013_v52 = vld [vmem:[#allocation5 + $0x110] sm:$0xff]   ;;  %v793_v53 = vcombine.high %v63_v51, %v63_v51  ;;  %v1015_v56 = vld [vmem:[#allocation5 + $0x108] sm:$0xff]   ;;  %v1017_v58 = vld [vmem:[#allocation5 + $0x100] sm:$0xff]   ;;  %v792_v59 = vcombine.low %v63_v51, %v63_v51 }
  0x37   :  { %864 = vmatpush3.bf16.msra.mxu0 %v983_v17  ;;  %v1022_v60 = vld [vmem:[#allocation7 + $0x38] sm:$0xff]   ;;  %v1023_v61 = vld [vmem:[#allocation7 + $0x30] sm:$0xff]   ;;  %v1024_v62 = vld [vmem:[#allocation7 + $0x28] sm:$0xff]  }
  0x38   :  { %865 = vmatprep.subr.bf16.mxu0 %v986_v20  ;;  %v1025_v63 = vld [vmem:[#allocation7 + $0x20] sm:$0xff]   ;;  %v1026_v0 = vld [vmem:[#allocation7 + $0x18] sm:$0xff]   ;;  %v1027_v1 = vld [vmem:[#allocation7 + $0x10] sm:$0xff]  }
  0x39   :  { %886 = vmatpush3.bf16.msra.mxu1 %v985_v19  ;;  %v1028_v2 = vld [vmem:[#allocation7 + $0x8] sm:$0xff]   ;;  %v1029_v3 = vld [vmem:[#allocation7] sm:$0xff]   ;;  %v787_v17 = vld [vmem:[%s1180_s2] ss:$0 sm:$0xff] }
  0x3a   :  { %887 = vmatprep.subr.bf16.mxu1 %v988_v22  ;;  %v846_v33 = vld [vmem:[%s1182_s4] ss:$0 sm:$0xff] }
  0x3b   :  { %866 = vmatpush3.bf16.msra.mxu0 %v987_v21 }
  0x3c   :  { %867 = vmatprep.subr.bf16.mxu0 %v990_v24 }
  0x3d   :  { %888 = vmatpush3.bf16.msra.mxu1 %v989_v23 }
  0x3e   :  { %889 = vmatprep.subr.bf16.mxu1 %v992_v26 }
  0x3f   :  { %868 = vmatpush3.bf16.msra.mxu0 %v991_v25 }
  0x40   :  { %869 = vmatprep.subr.bf16.mxu0 %v994_v28 }
  0x41   :  { %890 = vmatpush3.bf16.msra.mxu1 %v993_v27 }
  0x42   :  { %891 = vmatprep.subr.bf16.mxu1 %v996_v30 }
  0x43   :  { %870 = vmatpush3.bf16.msra.mxu0 %v995_v29 }
  0x44   :  { %899 = vmatprep.subr.bf16.mxu0 %v1000_v35 }
  0x45   :  { %892 = vmatpush3.bf16.msra.mxu1 %v999_v34 }
  0x46   :  { %525 = vmatmul.mubr.bf16.vlgmr.msra.gmra.mxu0 %v788_v32  ;;  %932 = vmatprep.subr.bf16.mxu1 %v1125_v43 }
  0x47   :  { %900 = vmatpush3.bf16.msra.mxu0 %v1003_v39  ;;  %604 = vmatprep.mubr.bf16.mxu0 %v793_v53 }
  0x48   :  { %565 = vmatmul.mubr.bf16.vlgmr.msra.gmra.mxu1 %v790_v37  ;;  %901 = vmatprep.subr.bf16.mxu0 %v1004_v40 }
  0x49   :  { %934 = vmatprep.mubr.msk.bf16.mxu1 %vm1126_vm0, %v1125_v43  ;;  %933 = vmatpush3.bf16.msra.mxu1 %v1018_v50 }
  0x4a   :  { %938 = vmatprep.subr.bf16.mxu1 %v1125_v43 }
  0x4b   :  { %902 = vmatpush3.bf16.msra.mxu0 %v1005_v41 }
  0x4c   :  { %903 = vmatprep.subr.bf16.mxu0 %v1006_v42 }
  0x4f   :  { %904 = vmatpush3.bf16.msra.mxu0 %v1007_v44 }
  0x50   :  { %905 = vmatprep.subr.bf16.mxu0 %v1008_v45  ;;  %935 = vmatmul.mubr.msk.bf16.vlgmr.msra.gmra.mxu1 %vm488_vm1, %v1021_v54 }
  0x51   :  { %954 = vmatprep.mubr.msk.bf16.mxu1 %vm1126_vm0, %v1125_v43  ;;  %939 = vmatpush3.bf16.msra.mxu1 %v1022_v60 }
  0x52   :  { %940 = vmatprep.subr.bf16.mxu1 %v1125_v43 }
  0x53   :  { %906 = vmatpush3.bf16.msra.mxu0 %v1009_v46 }
  0x54   :  { %907 = vmatprep.subr.bf16.mxu0 %v1010_v47 }
  0x55   :  { %941 = vmatpush3.bf16.msra.mxu1 %v1023_v61 }
  0x56   :  { %942 = vmatprep.subr.bf16.mxu1 %v1125_v43 }
  0x57   :  { %908 = vmatpush3.bf16.msra.mxu0 %v1011_v48 }
  0x58   :  { %909 = vmatprep.subr.bf16.mxu0 %v1012_v49 }
  0x59   :  { %943 = vmatpush3.bf16.msra.mxu1 %v1024_v62 }
  0x5a   :  { %944 = vmatprep.subr.bf16.mxu1 %v1125_v43 }
  0x5b   :  { %910 = vmatpush3.bf16.msra.mxu0 %v1013_v52 }
  0x5c   :  { %911 = vmatprep.subr.bf16.mxu0 %v1014_v55 }
  0x5d   :  { %945 = vmatpush3.bf16.msra.mxu1 %v1025_v63 }
  0x5e   :  { %946 = vmatprep.subr.bf16.mxu1 %v1125_v43 }
  0x5f   :  { %912 = vmatpush3.bf16.msra.mxu0 %v1015_v56 }
  0x60   :  { %913 = vmatprep.subr.bf16.mxu0 %v1016_v57 }
  0x61   :  { %947 = vmatpush3.bf16.msra.mxu1 %v1026_v0 }
  0x62   :  { %948 = vmatprep.subr.bf16.mxu1 %v1125_v43 }
  0x63   :  { %914 = vmatpush3.bf16.msra.mxu0 %v1017_v58 }
  0x65   :  { %949 = vmatpush3.bf16.msra.mxu1 %v1027_v1 }
  0x66   :  { %605 = vmatmul.mubr.bf16.vlgmr.msra.gmra.mxu0 %v792_v59  ;;  %950 = vmatprep.subr.bf16.mxu1 %v1125_v43 }
  0x69   :  { %951 = vmatpush3.bf16.msra.mxu1 %v1028_v2 }
  0x6a   :  { %952 = vmatprep.subr.bf16.mxu1 %v1125_v43 }
  0x6d   :  { %953 = vmatpush3.bf16.msra.mxu1 %v1029_v3 }
 0x106   :  { %v871_v4 = vpop.f32.mrf.mxu0 }
 0x108   :  { %v872_v5 = vpop.f32.mrf.mxu0  ;;  %v893_v6 = vpop.f32.mrf.mxu1 }
 0x109   :  { %v873_v16 = vadd.f32 %v872_v5, %v871_v4 }
 0x10a   :  { %v874_v7 = vpop.f32.mrf.mxu0  ;;  %v894_v8 = vpop.f32.mrf.mxu1 }
 0x10b   :  { %v527_v18 = vadd.f32 %v873_v16, %v787_v17  ;;  %v895_v19 = vadd.f32 %v894_v8, %v893_v6 }
 0x10c   :  { %v875_v9 = vpop.f32.mrf.mxu0  ;;  %v896_v10 = vpop.f32.mrf.mxu1 }
 0x10d   :  { %v567_v22 = vadd.f32 %v895_v19, %v527_v18 }
 0x10e   :  { %v897_v11 = vpop.f32.mrf.mxu1 }
 0x110   :  { %v646_v12 = vpop.f32.mrf.mxu1 }
 0x112   :  { %v936_v13 = vpop.f32.mrf.mxu1 }
 0x114   :  { %v649_v14 = vpop.f32.mrf.mxu1 }
 0x116   :  { %v937_v15 = vpop.f32.mrf.mxu1 }
 0x126   :  { %v915_v20 = vpop.f32.mrf.mxu0 }
 0x128   :  { %v916_v21 = vpop.f32.mrf.mxu0 }
 0x129   :  { %v917_v23 = vadd.f32 %v916_v21, %v915_v20 }
 0x12a   :  { %v918_v24 = vpop.f32.mrf.mxu0 }
 0x12b   :  { %v607_v25 = vadd.f32 %v917_v23, %v567_v22 }
 0x12c   :  { %v919_v26 = vpop.f32.mrf.mxu0 }
 0x12d   :  { %v647_v27 = vadd.f32 %v646_v12, %v607_v25 }
 0x12f   :  { %v845_v28 = vmul.f32 -1.442695, %v647_v27 }
 0x131   :  { %1030 = vpow2.f32 %v845_v28 }
 0x13e   :  { %v1031_v29 = vpop.eup %1030 }
 0x13f   :  { %v655_v30 = vadd.f32 1.0, %v1031_v29 }
 0x141   :  { %1032 = vrcp.f32 %v655_v30 }
 0x14e   :  { %v1033_v31 = vpop.eup %1032 }
 0x14f   :  { %v658_v32 = vpack.c.bf16 %v1033_v31, %v1033_v31 }
 0x151   :  { %955 = vmatmul.mubr.bf16.vlgmr.msra.gmra.mxu1 %v658_v32 }
 0x211   :  { %v764_v34 = vpop.f32.mrf.mxu1 }
 0x212   :  { %v765_v35 = vadd.f32 %v846_v33, %v764_v34 }
 0x213   :  { %v956_v36 = vpop.f32.mrf.mxu1 }
 0x214   :  { %770 = vst [vmem:[#allocation8] sm:$0xff] %v765_v35 }
 0x215   :  { %v767_v37 = vpop.f32.mrf.mxu1 }
 0x216   :  { %1105 = shalt.err (!%p1102_p5)
}
 0x217   :  { %780 = dma.vmem_to_hbm [thread:$0]  %s778_s11, 128, %s1183_s5, [#allocation4]   ;;  %v957_v38 = vpop.f32.mrf.mxu1 }
 0x218   :  { %1118 = dma.done.wait [#allocation4], 128  }
 0x219   :  { %1119 = vsyncadd [#allocation4], 4294967168 }
 0x21a   :  { %784 = vsyncpa [#allocation3], 1 }
 0x21b   :  { %785 = vsyncpa [#allocation6], 1 }
 0x21c   :  { %786 = vsyncpa [#allocation4], 1 }

</bundles_post_ra>
